<compile_context>
chip_gen: v6e
topology: v6e:2x2x1
jax: 0.10.0
libtpu: 0.0.40
codegen_flags: <defaults>
</compile_context>

<pallas_src>
import numpy as np
import jax
import jax.numpy as jnp
from jax.experimental import pallas as pl
from jax.experimental.pallas import tpu as pltpu


# ---------------------------------------------------------------------------
# Kernels
# ---------------------------------------------------------------------------

def _maxish_soft_kernel(scale_ref, x_ref, o_ref, m_acc, den_acc, num_acc):
    """Online softmax-weighted sum over axis 0 of the (TK, TD) block.

    out = sum(e * x) / sum(e),  e = exp(x*scale - running_max)
    """
    k = pl.program_id(1)
    scale = scale_ref[0]                              # SMEM scalar
    x = x_ref[...].astype(jnp.float32)                # (TK, TD)
    z = x * scale
    m_blk = jnp.max(z, axis=0, keepdims=True)         # (1, TD)  (XLU)
    e = jnp.exp(z - m_blk)                            # (EUP)
    den_blk = jnp.sum(e, axis=0, keepdims=True)
    num_blk = jnp.sum(e * x, axis=0, keepdims=True)

    @pl.when(k == 0)
    def _():
        m_acc[...] = m_blk
        den_acc[...] = den_blk
        num_acc[...] = num_blk

    @pl.when(k > 0)
    def _():
        m_new = jnp.maximum(m_acc[...], m_blk)
        a_old = jnp.exp(m_acc[...] - m_new)
        a_blk = jnp.exp(m_blk - m_new)
        den_acc[...] = a_old * den_acc[...] + a_blk * den_blk
        num_acc[...] = a_old * num_acc[...] + a_blk * num_blk
        m_acc[...] = m_new

    @pl.when(k == pl.num_programs(1) - 1)
    def _():
        # Exact division on the reduced (1, TD) result only — TD divides
        # total instead of K*TD, and keeps the 1e-5 test tolerance.
        o_ref[...] = (num_acc[...] / den_acc[...]).astype(o_ref.dtype)


def _maxish_hard_kernel(x_ref, o_ref, m_acc):
    """Online true max over axis 0 of the (TK, TD) block."""
    k = pl.program_id(1)
    blk = jnp.max(x_ref[...], axis=0, keepdims=True).astype(m_acc.dtype)

    @pl.when(k == 0)
    def _():
        m_acc[...] = blk

    @pl.when(k > 0)
    def _():
        m_acc[...] = jnp.maximum(m_acc[...], blk)

    @pl.when(k == pl.num_programs(1) - 1)
    def _():
        o_ref[...] = m_acc[...].astype(o_ref.dtype)


# ---------------------------------------------------------------------------
# Wrapper
# ---------------------------------------------------------------------------

def _round_up(a, b):
    return ((a + b - 1) // b) * b


def _choose_tiles(K, M):
    # Lane tile: full when small, otherwise a 128-multiple in the 256-512
    # range (>=2 lane tiles feeds both v7x TensorCores; bounded VMEM).
    if M <= 256:
        TD = M
    elif M <= 2048:
        TD = 256
    else:
        TD = 512
    # Reduction tile: full when small, otherwise cap so a block stays ~<=2 MiB
    # (well under the 16/32 MiB scoped-VMEM defaults with double buffering).
    TK = K if K <= 1024 else 1024
    return TK, TD


def maxish(x, scale, dim=1, keepdim=True, *, k_tile=None, d_tile=None):
    """Pallas TPU version of Maxish.forward.

    `scale` must be a concrete Python scalar (branch decided at trace time,
    same as the PyTorch `if scale > 0`); its value is fed to the kernel via
    SMEM, so distinct scale values reuse one compiled kernel.
    """
    x = jnp.asarray(x)
    nd = x.ndim
    dim = dim % nd
    orig_shape = x.shape
    rest_shape = orig_shape[:dim] + orig_shape[dim + 1:]

    K = int(orig_shape[dim])
    M = int(np.prod(rest_shape)) if rest_shape else 1

    # Lane-dense canonicalization: [K, M], reduction axis on sublanes.
    x2 = jnp.moveaxis(x, dim, 0).reshape(K, M)

    TK, TD = _choose_tiles(K, M)
    if k_tile is not None:
        TK = K if k_tile >= K else _round_up(k_tile, 8)
    if d_tile is not None:
        TD = M if d_tile >= M else _round_up(d_tile, 128)

    Kp = _round_up(K, TK)
    Mp = _round_up(M, TD)

    # Pad lanes with zeros (sliced off afterwards) and the reduction axis
    # with the most-negative value (identity for max / ~0 weight for softmax).
    if Mp != M:
        x2 = jnp.pad(x2, ((0, 0), (0, Mp - M)))
    if Kp != K:
        if jnp.issubdtype(x2.dtype, jnp.floating):
            fill = float(jnp.finfo(x2.dtype).min)
        else:
            fill = int(jnp.iinfo(x2.dtype).min)
        x2 = jnp.pad(x2, ((0, Kp - K), (0, 0)), constant_values=fill)

    grid = (Mp // TD, Kp // TK)           # (lane tiles, reduction tiles)
    acc_dtype = (jnp.float32 if jnp.issubdtype(x2.dtype, jnp.floating)
                 else x2.dtype)

    x_spec = pl.BlockSpec((TK, TD), lambda d, k: (k, d))
    o_spec = pl.BlockSpec((1, TD), lambda d, k: (0, d))
    cparams = pltpu.CompilerParams(
        dimension_semantics=("parallel", "arbitrary"))

    if scale > 0:
        scale_arr = jnp.asarray([scale], dtype=jnp.float32)
        out2 = pl.pallas_call(
            _maxish_soft_kernel,
            out_shape=jax.ShapeDtypeStruct((1, Mp), x2.dtype),
            grid=grid,
            in_specs=[
                pl.BlockSpec(memory_space=pltpu.MemorySpace.SMEM),  # scale
                x_spec,
            ],
            out_specs=o_spec,
            scratch_shapes=[pltpu.VMEM((1, TD), jnp.float32),   # running max
                            pltpu.VMEM((1, TD), jnp.float32),   # running den
                            pltpu.VMEM((1, TD), jnp.float32)],  # running num
            compiler_params=cparams,
        )(scale_arr, x2)
    else:
        out2 = pl.pallas_call(
            _maxish_hard_kernel,
            out_shape=jax.ShapeDtypeStruct((1, Mp), x2.dtype),
            grid=grid,
            in_specs=[x_spec],
            out_specs=o_spec,
            scratch_shapes=[pltpu.VMEM((1, TD), acc_dtype)],
            compiler_params=cparams,
        )(x2)

    out = out2[0, :M].reshape(rest_shape)
    if keepdim:
        out = jnp.expand_dims(out, dim)
    return out


# ---------------------------------------------------------------------------
# Pure-JAX reference + tests
# ---------------------------------------------------------------------------

def _maxish_ref(x, scale, dim=1, keepdim=True):
    if scale > 0:
        w = jax.nn.softmax(x * scale, axis=dim)
        return jnp.sum(w * x, axis=dim, keepdims=keepdim)
    return jnp.max(x, axis=dim, keepdims=keepdim)


if __name__ == "__main__":
    key = jax.random.PRNGKey(0)
    k0, k1, k2 = jax.random.split(key, 3)

    batch, seq, xdim = 2, 8, 32
    x = jax.random.normal(k0, (batch, seq, xdim), dtype=jnp.float32)

    # 1) Hard-max branch (scale <= 0), default dim=1, keepdim=True.
    out_hard = jax.block_until_ready(maxish(x, scale=-1, dim=1, keepdim=True))
    ref_hard = _maxish_ref(x, scale=-1, dim=1, keepdim=True)
    assert out_hard.shape == (batch, 1, xdim)
    np.testing.assert_allclose(np.asarray(out_hard), np.asarray(ref_hard),
                               rtol=1e-6, atol=1e-6)

    # 2) Soft branch (scale > 0).
    out_soft = jax.block_until_ready(maxish(x, scale=5.0, dim=1, keepdim=True))
    ref_soft = _maxish_ref(x, scale=5.0, dim=1, keepdim=True)
    assert out_soft.shape == (batch, 1, xdim)
    np.testing.assert_allclose(np.asarray(out_soft), np.asarray(ref_soft),
                               rtol=1e-5, atol=1e-5)

    # 3) dim=-1, keepdim=False (as used by the Or formula) — lane-dense now.
    xx = jnp.stack([x, -x], axis=-1)                    # (batch, seq, xdim, 2)
    out_or = jax.block_until_ready(maxish(xx, scale=-1, dim=-1, keepdim=False))
    ref_or = _maxish_ref(xx, scale=-1, dim=-1, keepdim=False)
    assert out_or.shape == (batch, seq, xdim)
    np.testing.assert_allclose(np.asarray(out_or), np.asarray(ref_or),
                               rtol=1e-6, atol=1e-6)

    # 4) Exercise the tiled / online-accumulator path (K and lane tiling with
    #    padding on both axes) at small shapes by forcing small tiles.
    xt = jax.random.normal(k1, (3, 30, 100), dtype=jnp.float32)  # M=300, K=30
    out_t_hard = jax.block_until_ready(
        maxish(xt, scale=-1, dim=1, keepdim=True, k_tile=8, d_tile=128))
    np.testing.assert_allclose(np.asarray(out_t_hard),
                               np.asarray(_maxish_ref(xt, -1, 1, True)),
                               rtol=1e-6, atol=1e-6)
    out_t_soft = jax.block_until_ready(
        maxish(xt, scale=3.0, dim=1, keepdim=True, k_tile=8, d_tile=128))
    np.testing.assert_allclose(np.asarray(out_t_soft),
                               np.asarray(_maxish_ref(xt, 3.0, 1, True)),
                               rtol=1e-5, atol=1e-5)

    # 5) bf16 input stays bf16 on the wire; f32 accumulation inside.
    xb = jax.random.normal(k2, (batch, seq, xdim), dtype=jnp.bfloat16)
    out_b = jax.block_until_ready(maxish(xb, scale=5.0, dim=1, keepdim=True))
    ref_b = _maxish_ref(xb.astype(jnp.float32), 5.0, 1, True)
    np.testing.assert_allclose(np.asarray(out_b, dtype=np.float32),
                               np.asarray(ref_b), rtol=2e-2, atol=2e-2)

    print("KERNEL_OK")
</pallas_src>

<mosaic_0001>
module attributes {stable_mosaic.version = 11 : i64} {
  func.func @_maxish_hard_kernel(%arg0: i32, %arg1: i32, %arg2: memref<8x64xf32, #tpu.memory_space<vmem>>, %arg3: memref<1x64xf32, #tpu.memory_space<vmem>>, %arg4: memref<1x64xf32, #tpu.memory_space<vmem>>) attributes {dimension_semantics = [#tpu.dimension_semantics<parallel>, #tpu.dimension_semantics<arbitrary>], iteration_bounds = array<i64: 1, 1>, scalar_prefetch = 0 : i64, scratch_operands = 1 : i64, tpu.core_type = #tpu.core_type<tc>, window_params = [{transform_indices = @transform_0, window_bounds = array<i64: 8, 64>}, {transform_indices = @transform_1, window_bounds = array<i64: 1, 64>}]} {
    %c0 = arith.constant 0 : index
    %c0_0 = arith.constant 0 : index
    %0 = vector.load %arg2[%c0, %c0_0] : memref<8x64xf32, #tpu.memory_space<vmem>>, vector<8x64xf32>
    %cst = arith.constant dense<0xFF800000> : vector<64xf32>
    %1 = vector.multi_reduction <maximumf>, %0, %cst [0] : vector<8x64xf32> to vector<64xf32>
    %2 = vector.shape_cast %1 : vector<64xf32> to vector<1x64xf32>
    %c0_i32 = arith.constant 0 : i32
    %3 = arith.cmpi eq, %arg1, %c0_i32 : i32
    %4 = arith.extui %3 : i1 to i32
    %c0_i32_1 = arith.constant 0 : i32
    %5 = arith.cmpi ne, %4, %c0_i32_1 : i32
    scf.if %5 {
      %c0_6 = arith.constant 0 : index
      %c0_7 = arith.constant 0 : index
      %12 = vector.load %arg4[%c0_6, %c0_7] : memref<1x64xf32, #tpu.memory_space<vmem>>, vector<1x64xf32>
      tpu.vector_store %arg4[%c0_6, %c0_7], %2 {strides = array<i32>} : memref<1x64xf32, #tpu.memory_space<vmem>>, vector<1x64xf32>,
    } else {
    }
    %c0_i32_2 = arith.constant 0 : i32
    %6 = arith.cmpi sgt, %arg1, %c0_i32_2 : i32
    %7 = arith.extui %6 : i1 to i32
    %c0_i32_3 = arith.constant 0 : i32
    %8 = arith.cmpi ne, %7, %c0_i32_3 : i32
    scf.if %8 {
      %c0_6 = arith.constant 0 : index
      %c0_7 = arith.constant 0 : index
      %12 = vector.load %arg4[%c0_6, %c0_7] : memref<1x64xf32, #tpu.memory_space<vmem>>, vector<1x64xf32>
      %13 = arith.maximumf %12, %2 : vector<1x64xf32>
      %c0_8 = arith.constant 0 : index
      %c0_9 = arith.constant 0 : index
      %14 = vector.load %arg4[%c0_8, %c0_9] : memref<1x64xf32, #tpu.memory_space<vmem>>, vector<1x64xf32>
      tpu.vector_store %arg4[%c0_8, %c0_9], %13 {strides = array<i32>} : memref<1x64xf32, #tpu.memory_space<vmem>>, vector<1x64xf32>,
    } else {
    }
    %c0_i32_4 = arith.constant 0 : i32
    %9 = arith.cmpi eq, %arg1, %c0_i32_4 : i32
    %10 = arith.extui %9 : i1 to i32
    %c0_i32_5 = arith.constant 0 : i32
    %11 = arith.cmpi ne, %10, %c0_i32_5 : i32
    scf.if %11 {
      %c0_6 = arith.constant 0 : index
      %c0_7 = arith.constant 0 : index
      %12 = vector.load %arg4[%c0_6, %c0_7] : memref<1x64xf32, #tpu.memory_space<vmem>>, vector<1x64xf32>
      %c0_8 = arith.constant 0 : index
      %c0_9 = arith.constant 0 : index
      %13 = vector.load %arg3[%c0_8, %c0_9] : memref<1x64xf32, #tpu.memory_space<vmem>>, vector<1x64xf32>
      tpu.vector_store %arg3[%c0_8, %c0_9], %12 {strides = array<i32>} : memref<1x64xf32, #tpu.memory_space<vmem>>, vector<1x64xf32>,
    } else {
    }
    return
  }
  func.func @transform_0(%arg0: i32, %arg1: i32) -> (i32, i32) {
    %c0_i32 = arith.constant 0 : i32
    return %arg1, %arg0 : i32, i32
  }
  func.func @transform_1(%arg0: i32, %arg1: i32) -> (i32, i32) {
    %c0_i32 = arith.constant 0 : i32
    %c0_i32_0 = arith.constant 0 : i32
    return %c0_i32, %arg0 : i32, i32
  }
}

</mosaic_0001>

<bundles_post_ra>
// kernel: tpu_custom_call.1
= control target key start
LH: loop header
LB: loop body
LE: loop exit
PB: predicated region body
PF: predicated region fallthrough
CT: control target
= control target key end

     0   :  { %6 = vsyncpa [#allocation4], 0  ;;  %s129_s0 = inlined_call_operand.hbm [shape: f32[8,64], index: 0, kind: input, shape index: {}]   ;;  %s130_s1 = inlined_call_operand.hbm [shape: f32[1,64], index: 1, kind: output, shape index: {}]  }
   0x1   :  { %7 = vsyncpa [#allocation5], 0  ;;  %s111_s6 = smov [#allocation3]  }
   0x2   :  { %s14_s7 = sshll.u32 %s111_s6, 4  ;;  %s15_s7 = int_to_ptr.vmem [resolvable:$true] %s14_s7 }
   0x3   :  { %s75_s8 = scalar_lea.vmem %s15_s7, 128  ;;  %p80_p1 = scmp.lt.s32.totalorder %s15_s7, %s15_s7 }
   0x4   :  { %p76_p0 = scmp.ne.s32.totalorder %s15_s7, %s75_s8  ;;  %p81_p2 = scmp.lt.s32.totalorder %s75_s8, %s75_s8 }
   0x6   :  { %p82_p3 = por %p81_p2, %p80_p1 }
   0x8   :  { %p83_p4 = pnand %p82_p3, %p76_p0 }
   0xa   :  { %86 = shalt.err (!%p83_p4)
}
   0xb   :  { %17 = dma.hbm_to_vmem [thread:$0]  %s129_s0, 128, %s15_s7, [#allocation4]  }
   0xc   :  { %107 = dma.done.wait [#allocation4], 128  }
   0xd   :  { %108 = vsyncadd [#allocation4], 4294967168  ;;  %vm22_vm0 = vcmask 523264   ;;  %v21_v0 = vld [vmem:[#allocation3] sm:$0xff]  ;;  %vm34_vm1 = vcmask 516096   ;;  %s112_s11 = smov [#allocation6]  }
   0xe   :  { %v23_v1 = vsel %vm22_vm0, %v21_v0, -inf  ;;  %s56_s12 = sshll.u32 %s112_s11, 4  ;;  %s57_s12 = int_to_ptr.vmem [resolvable:$true] %s56_s12 }
   0xf   :  { %v24_v2 = vrot.slane %v23_v1, 4  ;;  %s87_s13 = scalar_lea.vmem %s57_s12, 16  ;;  %s91_s0 = scalar_lea.vmem %s57_s12, 32 }
  0x10   :  { %p88_p5 = scmp.ne.s32.totalorder %s57_s12, %s87_s13  ;;  %p92_p6 = scmp.lt.s32.totalorder %s57_s12, %s57_s12 }
  0x11   :  { %v25_v3 = vmax.f32 %v23_v1, %v24_v2  ;;  %p93_p7 = scmp.lt.s32.totalorder %s91_s0, %s87_s13 }
  0x13   :  { %v26_v4 = vrot.slane %v25_v3, 2  ;;  %p94_p8 = por %p93_p7, %p92_p6 }
  0x15   :  { %v27_v5 = vmax.f32 %v25_v3, %v26_v4  ;;  %p95_p9 = pnand %p94_p8, %p88_p5 }
  0x17   :  { %v28_v6 = vrot.slane %v27_v5, 1 }
  0x19   :  { %v29_v7 = vmax.f32 %v27_v5, %v28_v6 }
  0x1b   :  { %35 = vst.msk [vmem:[#allocation2] sm:$0x1] %vm34_vm1, %v29_v7 }
  0x22   :  { %v47_v8 = vld [vmem:[#allocation2] sm:$0x1] }
  0x23   :  { %49 = vst.msk [vmem:[#allocation6] sm:$0x1] %vm34_vm1, %v47_v8 }
  0x24   :  { %98 = shalt.err (!%p95_p9)
}
  0x25   :  { %59 = dma.vmem_to_hbm [thread:$0]  %s57_s12, 16, %s130_s1, [#allocation5]  }
  0x26   :  { %109 = dma.done.wait [#allocation5], 16  }
  0x27   :  { %110 = vsyncadd [#allocation5], 4294967280 }
  0x28   :  { %63 = vsyncpa [#allocation4], 1 }
  0x29   :  { %64 = vsyncpa [#allocation5], 1 }

</bundles_post_ra>
